<compile_context>
chip_gen: v7x
topology: tpu7x:2x2x1
jax: 0.10.0
libtpu: 0.0.40
codegen_flags: <defaults>
</compile_context>

<pallas_src>
import functools
import math

import jax
import jax.numpy as jnp
from jax.experimental import pallas as pl
from jax.experimental.pallas import tpu as pltpu


_NEG_PAD = -1e30  # logits fill for padded class columns -> exp() == 0


def _round_up(x, m):
    return ((x + m - 1) // m) * m


def _tpu_info():
    """(vmem_capacity_bytes, tensorcores_per_chip, is_v5e) with safe fallbacks."""
    vmem = 64 << 20          # conservative fallback (v7x per-TC physical VMEM)
    num_tc = 1
    is_v5e = False
    try:
        vmem = int(pltpu.get_tpu_info().vmem_capacity_bytes)
    except Exception:
        pass
    try:
        kind = jax.devices()[0].device_kind.lower()
    except Exception:
        kind = ""
    if "v7" in kind:
        num_tc = 2
    if "v5 lite" in kind or "v5e" in kind or "v5litepod" in kind:
        is_v5e = True
    return vmem, num_tc, is_v5e


def _pick_class_block(C_pad, target):
    """Largest block <= target dividing C_pad; prefer 256-aligned, then 128."""
    target = max(128, target)
    if C_pad <= target:
        return C_pad
    for mult in (256, 128):
        cand = (target // mult) * mult
        while cand >= mult:
            if C_pad % cand == 0:
                return cand
            cand -= mult
    return 128  # C_pad is always a multiple of 128


def _choose_row_tile(M, D, tc, x_item, w_item, budget, *, row_cap, num_tc):
    # Row-independent cost: double-buffered W1/W2/b1/b2 class blocks.
    fixed = 2 * (2 * D * tc + tc + D) * w_item
    # Per-row cost: double-buffered x / out rows and logits block, f32
    # accumulators (acc, m, l), BOTH live (tm, tc) f32 intermediates (s, e),
    # plus alpha-broadcast / residual headroom.
    per_row = 2 * (2 * D + tc) * x_item + (2 * D + 2) * 4 + 2 * tc * 4 + 64
    avail = max(budget - fixed, 1 << 20)
    tm = int(avail // per_row)
    tm = min(row_cap, tm)
    tm = (tm // 128) * 128 if tm >= 128 else max(8, (tm // 8) * 8)
    tm = min(tm, _round_up(M, 8))            # never tile past the (padded) problem
    if num_tc >= 2 and M >= num_tc * 2 * 128:
        # Multi-TC chips only (v7x): keep >= 2 row tiles per TensorCore.
        tm = min(tm, max(128, _round_up(-(-M // (num_tc * 2)), 128)))
    if x_item < 4:                            # bf16/fp8 sublane packing
        tm = max(16, (tm // 16) * 16)
    tm = max(8, tm)
    return tm, fixed, per_row


# --------------------------------------------------------------------------
# Kernels
# --------------------------------------------------------------------------
def _kernel_single_block(x_ref, w1_ref, b1_ref, w2_ref, b2_ref,
                         out_ref, logits_ref, *, mm2_dtype):
    """C fits in a single class block: plain softmax, no running scratch."""
    x = x_ref[...]                                            # (tm, D)
    s = jnp.dot(x, w1_ref[...], preferred_element_type=jnp.float32)
    s = s + b1_ref[...].astype(jnp.float32)                   # (tm, C)
    logits_ref[...] = s.astype(logits_ref.dtype)

    m = jnp.max(s, axis=-1, keepdims=True)
    e = jnp.exp(s - m)
    l = jnp.sum(e, axis=-1, keepdims=True)
    inv_l = pl.reciprocal(l, approx=True)        # EUP seed (free slot)
    inv_l = inv_l * (2.0 - l * inv_l)            # one Newton step -> ~f32 exact
    p = e * inv_l
    y = jnp.dot(p.astype(mm2_dtype), w2_ref[...].astype(mm2_dtype),
                preferred_element_type=jnp.float32)
    y = y + b2_ref[...].astype(jnp.float32)
    out_ref[...] = (x.astype(jnp.float32) + y).astype(out_ref.dtype)


def _kernel_online(x_ref, w1_ref, b1_ref, w2_ref, b2_ref,
                   out_ref, logits_ref, m_sc, l_sc, acc_sc, *, mm2_dtype):
    """C tiled over an 'arbitrary' class axis with an online softmax."""
    j = pl.program_id(1)

    @pl.when(j == 0)
    def _():
        m_sc[...] = jnp.full_like(m_sc, -jnp.inf)
        l_sc[...] = jnp.zeros_like(l_sc)
        acc_sc[...] = jnp.zeros_like(acc_sc)

    x = x_ref[...]                                            # (tm, D)

    s = jnp.dot(x, w1_ref[...], preferred_element_type=jnp.float32)
    s = s + b1_ref[...].astype(jnp.float32)                   # (tm, tc)
    logits_ref[...] = s.astype(logits_ref.dtype)

    m_prev = m_sc[...]
    m_new = jnp.maximum(m_prev, jnp.max(s, axis=-1, keepdims=True))
    alpha = jnp.exp(m_prev - m_new)
    e = jnp.exp(s - m_new)                                    # (tm, tc) f32
    l_sc[...] = alpha * l_sc[...] + jnp.sum(e, axis=-1, keepdims=True)
    acc_sc[...] = alpha * acc_sc[...] + jnp.dot(
        e.astype(mm2_dtype), w2_ref[...].astype(mm2_dtype),
        preferred_element_type=jnp.float32)
    m_sc[...] = m_new

    @pl.when(j == pl.num_programs(1) - 1)
    def _():
        l = l_sc[...]
        inv_l = pl.reciprocal(l, approx=True)
        inv_l = inv_l * (2.0 - l * inv_l)
        y = acc_sc[...] * inv_l + b2_ref[...].astype(jnp.float32)
        out_ref[...] = (x.astype(jnp.float32) + y).astype(out_ref.dtype)


# --------------------------------------------------------------------------
# Wrapper
# --------------------------------------------------------------------------
def inter_ce_res_forward(x, w1, b1, w2, b2, *,
                         class_block_target=None,
                         use_bf16_matmul=False,
                         vmem_budget_bytes=None):
    """x: (B, S, D); w1: (D, C); b1: (C,); w2: (C, D); b2: (D,).

    Weights are stored pre-transposed to (in, out).  Returns (out, logits).
    `use_bf16_matmul=True` casts the p@W2 matmul to bf16 when weights are f32
    (opt-in numerics tradeoff, big MXU win on v6e/v7x).
    """
    B, S, D = x.shape
    Dw, C = w1.shape
    assert Dw == D and w2.shape == (C, D) and b1.shape == (C,) and b2.shape == (D,)

    vmem_phys, num_tc, is_v5e = _tpu_info()
    budget = int(0.72 * vmem_phys) if vmem_budget_bytes is None else int(vmem_budget_bytes)

    M = B * S
    x_item = jnp.dtype(x.dtype).itemsize
    w_item = jnp.dtype(w1.dtype).itemsize

    # ---- class-dim padding to a lane-dense multiple of 128 ----
    C_pad = _round_up(C, 128)
    if C_pad != C:
        w1 = jnp.pad(w1, ((0, 0), (0, C_pad - C)))
        b1 = jnp.pad(b1, (0, C_pad - C), constant_values=_NEG_PAD)  # exp -> 0
        w2 = jnp.pad(w2, ((0, C_pad - C), (0, 0)))

    # ---- class block (generation-aware target, weight-budget capped) ----
    if class_block_target is None:
        class_block_target = 2048 if budget >= (80 << 20) else 1024
    tc_weight_cap = int((0.4 * budget) // max(1, 4 * D * w_item))
    tc_weight_cap = max(128, (tc_weight_cap // 128) * 128)
    tc = _pick_class_block(C_pad, min(max(128, class_block_target), tc_weight_cap))

    # ---- row tile (v5e stays <=512; v6e/v7x up to 1024, budget permitting) ----
    row_cap = 512 if is_v5e else 1024
    tm, fixed, per_row = _choose_row_tile(M, D, tc, x_item, w_item, budget,
                                          row_cap=row_cap, num_tc=num_tc)

    M_pad = _round_up(M, tm)
    x2 = x.reshape(M, D)
    if M_pad != M:
        x2 = jnp.pad(x2, ((0, M_pad - M), (0, 0)))  # zero rows, sliced off

    b1_2 = b1.reshape(1, C_pad)
    b2_2 = b2.reshape(1, D)

    n_row = M_pad // tm
    n_cls = C_pad // tc

    mm2_dtype = w2.dtype
    if use_bf16_matmul and w2.dtype == jnp.float32:
        mm2_dtype = jnp.bfloat16

    # Explicit VMEM limit from the actual footprint, below physical VMEM.
    vmem_limit = fixed + tm * per_row + (8 << 20)
    vmem_limit = int(min(int(0.9 * vmem_phys), max(32 << 20, vmem_limit)))

    out_shape = (jax.ShapeDtypeStruct((M_pad, D), x.dtype),
                 jax.ShapeDtypeStruct((M_pad, C_pad), x.dtype))

    if n_cls == 1:
        # Specialized single-class-block path: no online-softmax machinery.
        kern = functools.partial(_kernel_single_block, mm2_dtype=mm2_dtype)
        out2, logits2 = pl.pallas_call(
            kern,
            out_shape=out_shape,
            grid_spec=pltpu.PrefetchScalarGridSpec(
                num_scalar_prefetch=0,
                grid=(n_row,),
                in_specs=[
                    pl.BlockSpec((tm, D), lambda i: (i, 0)),       # x rows
                    pl.BlockSpec((D, C_pad), lambda i: (0, 0)),    # W1 (resident)
                    pl.BlockSpec((1, C_pad), lambda i: (0, 0)),    # b1
                    pl.BlockSpec((C_pad, D), lambda i: (0, 0)),    # W2 (resident)
                    pl.BlockSpec((1, D), lambda i: (0, 0)),        # b2
                ],
                out_specs=[
                    pl.BlockSpec((tm, D), lambda i: (i, 0)),       # out rows
                    pl.BlockSpec((tm, C_pad), lambda i: (i, 0)),   # logits rows
                ],
            ),
            compiler_params=pltpu.CompilerParams(
                dimension_semantics=("parallel",),
                vmem_limit_bytes=vmem_limit,
            ),
        )(x2, w1, b1_2, w2, b2_2)
    else:
        kern = functools.partial(_kernel_online, mm2_dtype=mm2_dtype)
        out2, logits2 = pl.pallas_call(
            kern,
            out_shape=out_shape,
            grid_spec=pltpu.PrefetchScalarGridSpec(
                num_scalar_prefetch=0,
                grid=(n_row, n_cls),
                in_specs=[
                    pl.BlockSpec((tm, D), lambda i, j: (i, 0)),    # x rows (const over j)
                    pl.BlockSpec((D, tc), lambda i, j: (0, j)),    # W1 class block
                    pl.BlockSpec((1, tc), lambda i, j: (0, j)),    # b1 class block
                    pl.BlockSpec((tc, D), lambda i, j: (j, 0)),    # W2 class block
                    pl.BlockSpec((1, D), lambda i, j: (0, 0)),     # b2
                ],
                out_specs=[
                    pl.BlockSpec((tm, D), lambda i, j: (i, 0)),    # out (written at last j)
                    pl.BlockSpec((tm, tc), lambda i, j: (i, j)),   # logits block
                ],
                scratch_shapes=[
                    pltpu.VMEM((tm, 1), jnp.float32),   # running max
                    pltpu.VMEM((tm, 1), jnp.float32),   # running sum
                    pltpu.VMEM((tm, D), jnp.float32),   # running p @ W2 accumulator
                ],
            ),
            compiler_params=pltpu.CompilerParams(
                dimension_semantics=("parallel", "arbitrary"),
                vmem_limit_bytes=vmem_limit,
            ),
        )(x2, w1, b1_2, w2, b2_2)

    out = out2[:M].reshape(B, S, D)
    logits = logits2[:M, :C].reshape(B, S, C)
    return out, logits


# --------------------------------------------------------------------------
# Init / reference / tests
# --------------------------------------------------------------------------
def init_params(key, dim_model, num_classes, dtype=jnp.float32):
    """Deterministic synthetic init (PyTorch-style uniform ranges), (in, out) layout."""
    k1, k2, k3, k4 = jax.random.split(key, 4)
    bound1 = 1.0 / math.sqrt(dim_model)
    bound2 = 1.0 / math.sqrt(num_classes)
    w1 = jax.random.uniform(k1, (dim_model, num_classes), dtype, -bound1, bound1)
    b1 = jax.random.uniform(k2, (num_classes,), dtype, -bound1, bound1)
    w2 = jax.random.uniform(k3, (num_classes, dim_model), dtype, -bound2, bound2)
    b2 = jax.random.uniform(k4, (dim_model,), dtype, -bound2, bound2)
    return w1, b1, w2, b2


def _reference(x, w1, b1, w2, b2):
    xf = x.astype(jnp.float32)
    logits = jnp.einsum("bsd,dc->bsc", xf, w1.astype(jnp.float32),
                        precision=jax.lax.Precision.HIGHEST) + b1.astype(jnp.float32)
    p = jax.nn.softmax(logits, axis=-1)
    out = xf + jnp.einsum("bsc,cd->bsd", p, w2.astype(jnp.float32),
                          precision=jax.lax.Precision.HIGHEST) + b2.astype(jnp.float32)
    return out.astype(x.dtype), logits.astype(x.dtype)


def _check(name, x, w1, b1, w2, b2, atol=1e-4, rtol=1e-4, **kw):
    out, logits = inter_ce_res_forward(x, w1, b1, w2, b2, **kw)
    jax.block_until_ready((out, logits))
    out_ref, logits_ref = _reference(x, w1, b1, w2, b2)
    assert out.shape == out_ref.shape and logits.shape == logits_ref.shape
    assert jnp.allclose(logits.astype(jnp.float32), logits_ref.astype(jnp.float32),
                        atol=atol, rtol=rtol), f"{name}: logits mismatch"
    assert jnp.allclose(out.astype(jnp.float32), out_ref.astype(jnp.float32),
                        atol=atol, rtol=rtol), f"{name}: out mismatch"


if __name__ == "__main__":
    key = jax.random.PRNGKey(0)

    # Case 1: small lane-aligned shapes -> single-class-block fast path.
    kx, kp, key = jax.random.split(key, 3)
    x = jax.random.normal(kx, (2, 8, 256), jnp.float32)
    w1, b1, w2, b2 = init_params(kp, 256, 128)
    _check("case1", x, w1, b1, w2, b2)

    # Case 2: rows not divisible by the row tile (zero-pad remainder path).
    kx, kp, key = jax.random.split(key, 3)
    x = jax.random.normal(kx, (3, 5, 256), jnp.float32)
    w1, b1, w2, b2 = init_params(kp, 256, 128)
    _check("case2", x, w1, b1, w2, b2)

    # Case 3: force multiple class blocks -> online-softmax path.
    kx, kp, key = jax.random.split(key, 3)
    x = jax.random.normal(kx, (2, 8, 256), jnp.float32)
    w1, b1, w2, b2 = init_params(kp, 256, 1024)
    _check("case3", x, w1, b1, w2, b2, class_block_target=256)

    # Case 4: num_classes not a multiple of 128 -> class-dim padding path.
    kx, kp, key = jax.random.split(key, 3)
    x = jax.random.normal(kx, (2, 8, 256), jnp.float32)
    w1, b1, w2, b2 = init_params(kp, 256, 200)
    _check("case4", x, w1, b1, w2, b2)

    # Case 5: unaligned C AND multiple class blocks (padded tail block).
    kx, kp, key = jax.random.split(key, 3)
    x = jax.random.normal(kx, (2, 8, 256), jnp.float32)
    w1, b1, w2, b2 = init_params(kp, 256, 584)
    _check("case5", x, w1, b1, w2, b2, class_block_target=256)

    print("KERNEL_OK")
</pallas_src>

<mosaic_0001>
module attributes {stable_mosaic.version = 11 : i64} {
  func.func @_kernel_single_block(%arg0: i32, %arg1: memref<16x256xf32, #tpu.memory_space<vmem>>, %arg2: memref<256x128xf32, #tpu.memory_space<vmem>>, %arg3: memref<1x128xf32, #tpu.memory_space<vmem>>, %arg4: memref<128x256xf32, #tpu.memory_space<vmem>>, %arg5: memref<1x256xf32, #tpu.memory_space<vmem>>, %arg6: memref<16x256xf32, #tpu.memory_space<vmem>>, %arg7: memref<16x128xf32, #tpu.memory_space<vmem>>) attributes {dimension_semantics = [#tpu.dimension_semantics<parallel>], iteration_bounds = array<i64: 1>, scalar_prefetch = 0 : i64, scratch_operands = 0 : i64, tpu.core_type = #tpu.core_type<tc>, window_params = [{transform_indices = @transform_0, window_bounds = array<i64: 16, 256>}, {pipeline_mode = #tpu.pipeline_mode<synchronous>, transform_indices = @transform_1, window_bounds = array<i64: 256, 128>}, {pipeline_mode = #tpu.pipeline_mode<synchronous>, transform_indices = @transform_2, window_bounds = array<i64: 1, 128>}, {pipeline_mode = #tpu.pipeline_mode<synchronous>, transform_indices = @transform_3, window_bounds = array<i64: 128, 256>}, {pipeline_mode = #tpu.pipeline_mode<synchronous>, transform_indices = @transform_4, window_bounds = array<i64: 1, 256>}, {transform_indices = @transform_5, window_bounds = array<i64: 16, 256>}, {transform_indices = @transform_6, window_bounds = array<i64: 16, 128>}]} {
    %c0 = arith.constant 0 : index
    %c0_0 = arith.constant 0 : index
    %0 = vector.load %arg1[%c0, %c0_0] : memref<16x256xf32, #tpu.memory_space<vmem>>, vector<16x256xf32>
    %c0_1 = arith.constant 0 : index
    %c0_2 = arith.constant 0 : index
    %1 = vector.load %arg2[%c0_1, %c0_2] : memref<256x128xf32, #tpu.memory_space<vmem>>, vector<256x128xf32>
    %cst = arith.constant dense<0.000000e+00> : vector<16x128xf32>
    %2 = tpu.matmul %0, %1, %cst {dimension_numbers = #tpu.dot_dimension_numbers<[1], [0], [0], [1], [0, 0, 1, 1], [], []>} : vector<16x256xf32>, vector<256x128xf32>, vector<16x128xf32> -> vector<16x128xf32>
    %c0_3 = arith.constant 0 : index
    %c0_4 = arith.constant 0 : index
    %3 = vector.load %arg3[%c0_3, %c0_4] : memref<1x128xf32, #tpu.memory_space<vmem>>, vector<1x128xf32>
    %4 = vector.broadcast %3 : vector<1x128xf32> to vector<16x128xf32>
    %5 = arith.addf %2, %4 : vector<16x128xf32>
    %c0_5 = arith.constant 0 : index
    %c0_6 = arith.constant 0 : index
    %6 = vector.load %arg7[%c0_5, %c0_6] : memref<16x128xf32, #tpu.memory_space<vmem>>, vector<16x128xf32>
    tpu.vector_store %arg7[%c0_5, %c0_6], %5 {strides = array<i32>} : memref<16x128xf32, #tpu.memory_space<vmem>>, vector<16x128xf32>,
    %cst_7 = arith.constant dense<0xFF800000> : vector<16xf32>
    %7 = vector.multi_reduction <maximumf>, %5, %cst_7 [1] : vector<16x128xf32> to vector<16xf32>
    %8 = vector.shape_cast %7 : vector<16xf32> to vector<16x1xf32>
    %9 = vector.broadcast %8 : vector<16x1xf32> to vector<16x128xf32>
    %10 = arith.subf %5, %9 : vector<16x128xf32>
    %11 = math.exp %10 : vector<16x128xf32>
    %cst_8 = arith.constant dense<0.000000e+00> : vector<16xf32>
    %12 = vector.multi_reduction <add>, %11, %cst_8 [1] : vector<16x128xf32> to vector<16xf32>
    %13 = vector.shape_cast %12 : vector<16xf32> to vector<16x1xf32>
    %14 = tpu.reciprocal %13 {approx = true} : vector<16x1xf32> -> vector<16x1xf32>
    %15 = arith.mulf %13, %14 : vector<16x1xf32>
    %cst_9 = arith.constant 2.000000e+00 : f32
    %16 = vector.broadcast %cst_9 : f32 to vector<16x1xf32>
    %17 = arith.subf %16, %15 : vector<16x1xf32>
    %18 = arith.mulf %14, %17 : vector<16x1xf32>
    %19 = vector.broadcast %18 : vector<16x1xf32> to vector<16x128xf32>
    %20 = arith.mulf %11, %19 : vector<16x128xf32>
    %c0_10 = arith.constant 0 : index
    %c0_11 = arith.constant 0 : index
    %21 = vector.load %arg4[%c0_10, %c0_11] : memref<128x256xf32, #tpu.memory_space<vmem>>, vector<128x256xf32>
    %cst_12 = arith.constant dense<0.000000e+00> : vector<16x256xf32>
    %22 = tpu.matmul %20, %21, %cst_12 {dimension_numbers = #tpu.dot_dimension_numbers<[1], [0], [0], [1], [0, 0, 1, 1], [], []>} : vector<16x128xf32>, vector<128x256xf32>, vector<16x256xf32> -> vector<16x256xf32>
    %c0_13 = arith.constant 0 : index
    %c0_14 = arith.constant 0 : index
    %23 = vector.load %arg5[%c0_13, %c0_14] : memref<1x256xf32, #tpu.memory_space<vmem>>, vector<1x256xf32>
    %24 = vector.broadcast %23 : vector<1x256xf32> to vector<16x256xf32>
    %25 = arith.addf %22, %24 : vector<16x256xf32>
    %26 = arith.addf %0, %25 : vector<16x256xf32>
    %c0_15 = arith.constant 0 : index
    %c0_16 = arith.constant 0 : index
    %27 = vector.load %arg6[%c0_15, %c0_16] : memref<16x256xf32, #tpu.memory_space<vmem>>, vector<16x256xf32>
    tpu.vector_store %arg6[%c0_15, %c0_16], %26 {strides = array<i32>} : memref<16x256xf32, #tpu.memory_space<vmem>>, vector<16x256xf32>,
    return
  }
  func.func @transform_0(%arg0: i32) -> (i32, i32) {
    %c0_i32 = arith.constant 0 : i32
    %c0_i32_0 = arith.constant 0 : i32
    return %arg0, %c0_i32 : i32, i32
  }
  func.func @transform_1(%arg0: i32) -> (i32, i32) {
    %c0_i32 = arith.constant 0 : i32
    %c0_i32_0 = arith.constant 0 : i32
    %c0_i32_1 = arith.constant 0 : i32
    return %c0_i32, %c0_i32_0 : i32, i32
  }
  func.func @transform_2(%arg0: i32) -> (i32, i32) {
    %c0_i32 = arith.constant 0 : i32
    %c0_i32_0 = arith.constant 0 : i32
    %c0_i32_1 = arith.constant 0 : i32
    return %c0_i32, %c0_i32_0 : i32, i32
  }
  func.func @transform_3(%arg0: i32) -> (i32, i32) {
    %c0_i32 = arith.constant 0 : i32
    %c0_i32_0 = arith.constant 0 : i32
    %c0_i32_1 = arith.constant 0 : i32
    return %c0_i32, %c0_i32_0 : i32, i32
  }
  func.func @transform_4(%arg0: i32) -> (i32, i32) {
    %c0_i32 = arith.constant 0 : i32
    %c0_i32_0 = arith.constant 0 : i32
    %c0_i32_1 = arith.constant 0 : i32
    return %c0_i32, %c0_i32_0 : i32, i32
  }
  func.func @transform_5(%arg0: i32) -> (i32, i32) {
    %c0_i32 = arith.constant 0 : i32
    %c0_i32_0 = arith.constant 0 : i32
    return %arg0, %c0_i32 : i32, i32
  }
  func.func @transform_6(%arg0: i32) -> (i32, i32) {
    %c0_i32 = arith.constant 0 : i32
    %c0_i32_0 = arith.constant 0 : i32
    return %arg0, %c0_i32 : i32, i32
  }
}

</mosaic_0001>

<bundles_post_ra>
// kernel: tpu_custom_call.1
= control target key start
LH: loop header
LB: loop body
LE: loop exit
PB: predicated region body
PF: predicated region fallthrough
CT: control target
= control target key end

     0   :  { %12 = vsyncpa [#allocation3], 0  ;;  %s753_s0 = inlined_call_operand.hbm [shape: f32[16,256], index: 0, kind: input, shape index: {}]   ;;  %s754_s1 = inlined_call_operand.hbm [shape: f32[256,128], index: 1, kind: input, shape index: {}]   ;;  %s755_s2 = inlined_call_operand.vmem [shape: f32[1,128], index: 2, kind: input, shape index: {}]   ;;  %s756_s3 = inlined_call_operand.hbm [shape: f32[128,256], index: 3, kind: input, shape index: {}]   ;;  %s757_s4 = inlined_call_operand.vmem [shape: f32[1,256], index: 4, kind: input, shape index: {}]   ;;  %s758_s5 = inlined_call_operand.hbm [shape: f32[16,256], index: 5, kind: output, shape index: {0}]   ;;  %s759_s6 = inlined_call_operand.hbm [shape: f32[16,128], index: 6, kind: output, shape index: {1}]  }
   0x1   :  { %13 = vsyncpa [#allocation6], 0 }
   0x2   :  { %14 = vsyncpa [#allocation4], 0 }
   0x3   :  { %15 = vsyncpa [#allocation10], 0  ;;  %s611_s21 = smov [#allocation5]   ;;  %s493_s25 = scalar_lea.hbm %s754_s1, 4096 }
   0x4   :  { %s33_s22 = sshll.u32 %s611_s21, 4  ;;  %p494_p0 = scmp.ne.s32.totalorder %s754_s1, %s493_s25  ;;  %s34_s22 = int_to_ptr.vmem [resolvable:$true] %s33_s22 }
   0x5   :  { %p497_p1 = scmp.lt.u32.totalorder %s493_s25, %s754_s1 }
   0x7   :  { %p499_p2 = pnand %p497_p1, %p494_p0 }
   0x9   :  { %502 = shalt.err (!%p499_p2)
}
   0xa   :  { %s503_s30 = scalar_lea.vmem %s34_s22, 4096  ;;  %p508_p4 = scmp.lt.s32.totalorder %s34_s22, %s34_s22 }
   0xb   :  { %p504_p3 = scmp.ne.s32.totalorder %s34_s22, %s503_s30  ;;  %p509_p5 = scmp.lt.s32.totalorder %s503_s30, %s503_s30 }
   0xd   :  { %p510_p6 = por %p509_p5, %p508_p4 }
   0xf   :  { %p511_p7 = pnand %p510_p6, %p504_p3 }
  0x11   :  { %514 = shalt.err (!%p511_p7)
}
  0x12   :  { %s612_s7 = smov 128   ;;  %s613_s8 = smov 8  }
  0x13   :  { %39 = dma.hbm_to_vmem [thread:$0]  %s754_s1, 4096, %s34_s22, [#allocation6], %s612_s7, %s612_s7, %s613_s8  }
  0x14   :  { %s614_s11 = smov [#allocation2]   ;;  %s515_s15 = scalar_lea.hbm %s753_s0, 512 }
  0x15   :  { %s21_s12 = sshll.u32 %s614_s11, 4  ;;  %p516_p8 = scmp.ne.s32.totalorder %s753_s0, %s515_s15  ;;  %s22_s12 = int_to_ptr.vmem [resolvable:$true] %s21_s12 }
  0x16   :  { %p519_p9 = scmp.lt.u32.totalorder %s515_s15, %s753_s0 }
  0x18   :  { %p521_p10 = pnand %p519_p9, %p516_p8 }
  0x1a   :  { %524 = shalt.err (!%p521_p10)
}
  0x1b   :  { %s525_s20 = scalar_lea.vmem %s22_s12, 512  ;;  %p530_p12 = scmp.lt.s32.totalorder %s22_s12, %s22_s12 }
  0x1c   :  { %p526_p11 = scmp.ne.s32.totalorder %s22_s12, %s525_s20  ;;  %p531_p13 = scmp.lt.s32.totalorder %s525_s20, %s525_s20 }
  0x1e   :  { %p532_p0 = por %p531_p13, %p530_p12 }
  0x20   :  { %p533_p1 = pnand %p532_p0, %p526_p11 }
  0x22   :  { %536 = shalt.err (!%p533_p1)
}
  0x23   :  { %s615_s1 = smov 256   ;;  %s616_s21 = smov 16  }
  0x24   :  { %27 = dma.hbm_to_vmem [thread:$0]  %s753_s0, 512, %s22_s12, [#allocation3], %s615_s1, %s615_s1, %s616_s21  }
  0x25   :  { %s617_s24 = smov [#allocation7]   ;;  %s537_s28 = scalar_lea.hbm %s756_s3, 4096 }
  0x26   :  { %s47_s25 = sshll.u32 %s617_s24, 4  ;;  %p538_p2 = scmp.ne.s32.totalorder %s756_s3, %s537_s28  ;;  %s48_s25 = int_to_ptr.vmem [resolvable:$true] %s47_s25 }
  0x27   :  { %p541_p3 = scmp.lt.u32.totalorder %s537_s28, %s756_s3 }
  0x29   :  { %p543_p4 = pnand %p541_p3, %p538_p2 }
  0x2b   :  { %546 = shalt.err (!%p543_p4)
}
  0x2c   :  { %s547_s11 = scalar_lea.vmem %s48_s25, 4096  ;;  %p552_p6 = scmp.lt.s32.totalorder %s48_s25, %s48_s25 }
  0x2d   :  { %p548_p5 = scmp.ne.s32.totalorder %s48_s25, %s547_s11  ;;  %p553_p7 = scmp.lt.s32.totalorder %s547_s11, %s547_s11 }
  0x2f   :  { %p554_p8 = por %p553_p7, %p552_p6 }
  0x31   :  { %p555_p9 = pnand %p554_p8, %p548_p5 }
  0x33   :  { %558 = shalt.err (!%p555_p9)
}
  0x34   :  { %53 = dma.hbm_to_vmem [thread:$0]  %s756_s3, 4096, %s48_s25, [#allocation6], %s615_s1, %s615_s1, %s616_s21  }
  0x35   :  { %603 = dma.done.wait [#allocation3], 512  }
  0x36   :  { %604 = vsyncadd [#allocation3], 4294966784 }
  0x37   :  { %605 = dma.done.wait [#allocation6], 8192  }
  0x38   :  { %606 = vsyncadd [#allocation6], 4294959104  ;;  %v85_v0 = vld [vmem:[#allocation5 + $0x80] sm:$0xff]  ;;  %v86_v1 = vld [vmem:[#allocation5 + $0x88] sm:$0xff] }
  0x39   :  { %v69_v2 = vld [vmem:[#allocation5] sm:$0xff]  ;;  %v411_v3 = vpack.c.bf16 %v86_v1, %v85_v0  ;;  %v70_v4 = vld [vmem:[#allocation5 + $0x8] sm:$0xff]  ;;  %v87_v5 = vld [vmem:[#allocation5 + $0x90] sm:$0xff] }
  0x3a   :  { %v88_v6 = vld [vmem:[#allocation5 + $0x98] sm:$0xff]  ;;  %v413_v7 = vpack.c.bf16 %v70_v4, %v69_v2  ;;  %v71_v9 = vld [vmem:[#allocation5 + $0x10] sm:$0xff]  ;;  %v89_v11 = vld [vmem:[#allocation5 + $0xa0] sm:$0xff] }
  0x3b   :  { %v415_v8 = vpack.c.bf16 %v88_v6, %v87_v5  ;;  %v72_v10 = vld [vmem:[#allocation5 + $0x18] sm:$0xff]  ;;  %412 = vmatprep.subr.bf16.mxu0 %v411_v3  ;;  %v90_v12 = vld [vmem:[#allocation5 + $0xa8] sm:$0xff]  ;;  %v73_v15 = vld [vmem:[#allocation5 + $0x20] sm:$0xff] }
  0x3c   :  { %414 = vmatpush3.bf16.msra.mxu0 %v413_v7  ;;  %v417_v13 = vpack.c.bf16 %v72_v10, %v71_v9  ;;  %v419_v14 = vpack.c.bf16 %v90_v12, %v89_v11  ;;  %v74_v16 = vld [vmem:[#allocation5 + $0x28] sm:$0xff]  ;;  %v91_v17 = vld [vmem:[#allocation5 + $0xb0] sm:$0xff]  ;;  %v92_v18 = vld [vmem:[#allocation5 + $0xb8] sm:$0xff] }
  0x3d   :  { %416 = vmatprep.subr.bf16.mxu0 %v415_v8  ;;  %v421_v19 = vpack.c.bf16 %v74_v16, %v73_v15  ;;  %v423_v20 = vpack.c.bf16 %v92_v18, %v91_v17  ;;  %v75_v21 = vld [vmem:[#allocation5 + $0x30] sm:$0xff]  ;;  %v76_v22 = vld [vmem:[#allocation5 + $0x38] sm:$0xff]  ;;  %v93_v23 = vld [vmem:[#allocation5 + $0xc0] sm:$0xff] }
  0x3e   :  { %v94_v24 = vld [vmem:[#allocation5 + $0xc8] sm:$0xff]  ;;  %v425_v26 = vpack.c.bf16 %v76_v22, %v75_v21  ;;  %v77_v28 = vld [vmem:[#allocation5 + $0x40] sm:$0xff]  ;;  %v95_v30 = vld [vmem:[#allocation5 + $0xd0] sm:$0xff] }
  0x3f   :  { %v701_v25 = vld [vmem:[#allocation2 + $0x8] sm:$0xff]  ;;  %v427_v27 = vpack.c.bf16 %v94_v24, %v93_v23  ;;  %v96_v31 = vld [vmem:[#allocation5 + $0xd8] sm:$0xff]  ;;  %v79_v34 = vld [vmem:[#allocation5 + $0x50] sm:$0xff] }
  0x40   :  { %418 = vmatpush3.bf16.msra.mxu0 %v417_v13  ;;  %172 = vmatprep.mubr.f32.mxu0 %v701_v25  ;;  %v78_v29 = vld [vmem:[#allocation5 + $0x48] sm:$0xff]  ;;  %v431_v33 = vpack.c.bf16 %v96_v31, %v95_v30  ;;  %v80_v35 = vld [vmem:[#allocation5 + $0x58] sm:$0xff]  ;;  %v97_v36 = vld [vmem:[#allocation5 + $0xe0] sm:$0xff] }
  0x41   :  { %420 = vmatprep.subr.bf16.mxu0 %v419_v14  ;;  %v429_v32 = vpack.c.bf16 %v78_v29, %v77_v28  ;;  %v98_v37 = vld [vmem:[#allocation5 + $0xe8] sm:$0xff]  ;;  %v433_v38 = vpack.c.bf16 %v80_v35, %v79_v34  ;;  %v81_v40 = vld [vmem:[#allocation5 + $0x60] sm:$0xff]  ;;  %v99_v42 = vld [vmem:[#allocation5 + $0xf0] sm:$0xff] }
  0x42   :  { %v435_v39 = vpack.c.bf16 %v98_v37, %v97_v36  ;;  %v82_v41 = vld [vmem:[#allocation5 + $0x68] sm:$0xff]  ;;  %v100_v43 = vld [vmem:[#allocation5 + $0xf8] sm:$0xff]  ;;  %v83_v46 = vld [vmem:[#allocation5 + $0x70] sm:$0xff] }
  0x43   :  { %v437_v44 = vpack.c.bf16 %v82_v41, %v81_v40  ;;  %v439_v45 = vpack.c.bf16 %v100_v43, %v99_v42  ;;  %v84_v47 = vld [vmem:[#allocation5 + $0x78] sm:$0xff]  ;;  %v704_v49 = vld [vmem:[#allocation2] sm:$0xff]  ;;  %v710_v51 = vld [vmem:[#allocation2 + $0x10] sm:$0xff] }
  0x44   :  { %422 = vmatpush3.bf16.msra.mxu0 %v421_v19  ;;  %v441_v48 = vpack.c.bf16 %v84_v47, %v83_v46  ;;  %v706_v50 = vld [vmem:[#allocation2 + $0x18] sm:$0xff]  ;;  %v372_v53 = vld [vmem:[%s755_s2] ss:$0 sm:$0xff]  ;;  %v210_v61 = vld [vmem:[#allocation7 + $0x8] sm:$0xff]  ;;  %s619_s2 = smov [#allocation9]  }
  0x45   :  { %424 = vmatprep.subr.bf16.mxu0 %v423_v20  ;;  %v212_v62 = vld [vmem:[#allocation7 + $0x18] sm:$0xff]  ;;  %v209_v63 = vld [vmem:[#allocation7] sm:$0xff]  ;;  %v211_v1 = vld [vmem:[#allocation7 + $0x10] sm:$0xff]  ;;  %s355_s14 = sshll.u32 %s619_s2, 4  ;;  %s356_s14 = int_to_ptr.vmem [resolvable:$true] %s355_s14 }
  0x46   :  { %v443_v0 = vpack.c.bf16 %v212_v62, %v210_v61  ;;  %v214_v2 = vld [vmem:[#allocation7 + $0x28] sm:$0xff]  ;;  %v216_v3 = vld [vmem:[#allocation7 + $0x38] sm:$0xff]  ;;  %v445_v4 = vpack.c.bf16 %v211_v1, %v209_v63  ;;  %v213_v6 = vld [vmem:[#allocation7 + $0x20] sm:$0xff]  ;;  %s559_s15 = scalar_lea.vmem %s356_s14, 256  ;;  %p564_p11 = scmp.lt.s32.totalorder %s356_s14, %s356_s14 }
  0x47   :  { %v447_v5 = vpack.c.bf16 %v216_v3, %v214_v2  ;;  %v215_v7 = vld [vmem:[#allocation7 + $0x30] sm:$0xff]  ;;  %v218_v8 = vld [vmem:[#allocation7 + $0x48] sm:$0xff]  ;;  %v220_v9 = vld [vmem:[#allocation7 + $0x58] sm:$0xff]  ;;  %p560_p10 = scmp.ne.s32.totalorder %s356_s14, %s559_s15  ;;  %p565_p12 = scmp.lt.s32.totalorder %s559_s15, %s559_s15 }
  0x48   :  { %426 = vmatpush3.bf16.msra.mxu0 %v425_v26  ;;  %444 = vmatprep.subr.bf16.mxu1 %v443_v0  ;;  %v449_v10 = vpack.c.bf16 %v215_v7, %v213_v6  ;;  %v451_v11 = vpack.c.bf16 %v220_v9, %v218_v8  ;;  %v217_v12 = vld [vmem:[#allocation7 + $0x40] sm:$0xff]  ;;  %v219_v13 = vld [vmem:[#allocation7 + $0x50] sm:$0xff]  ;;  %v222_v14 = vld [vmem:[#allocation7 + $0x68] sm:$0xff] }
  0x49   :  { %428 = vmatprep.subr.bf16.mxu0 %v427_v27  ;;  %446 = vmatpush1.bf16.msra.mxu1 %v445_v4  ;;  %v224_v15 = vld [vmem:[#allocation7 + $0x78] sm:$0xff]  ;;  %v453_v16 = vpack.c.bf16 %v219_v13, %v217_v12  ;;  %v221_v27 = vld [vmem:[#allocation7 + $0x60] sm:$0xff]  ;;  %v223_v28 = vld [vmem:[#allocation7 + $0x70] sm:$0xff]  ;;  %p566_p13 = por %p565_p12, %p564_p11 }
  0x4a   :  { %448 = vmatprep.subr.bf16.mxu1 %v447_v5  ;;  %v455_v17 = vpack.c.bf16 %v224_v15, %v222_v14  ;;  %v457_v29 = vpack.c.bf16 %v223_v28, %v221_v27  ;;  %v226_v30 = vld [vmem:[#allocation7 + $0x88] sm:$0xff]  ;;  %v228_v31 = vld [vmem:[#allocation7 + $0x98] sm:$0xff]  ;;  %v227_v34 = vld [vmem:[#allocation7 + $0x90] sm:$0xff] }
  0x4b   :  { %v230_v36 = vld [vmem:[#allocation7 + $0xa8] sm:$0xff]  ;;  %v232_v37 = vld [vmem:[#allocation7 + $0xb8] sm:$0xff]  ;;  %v231_v40 = vld [vmem:[#allocation7 + $0xb0] sm:$0xff]  ;;  %p567_p0 = pnand %p566_p13, %p560_p10 }
  0x4c   :  { %430 = vmatpush3.bf16.msra.mxu0 %v429_v32  ;;  %v459_v32 = vpack.c.bf16 %v228_v31, %v226_v30  ;;  %v234_v42 = vld [vmem:[#allocation7 + $0xc8] sm:$0xff]  ;;  %v236_v43 = vld [vmem:[#allocation7 + $0xd8] sm:$0xff]  ;;  %v235_v46 = vld [vmem:[#allocation7 + $0xd0] sm:$0xff] }
  0x4d   :  { %432 = vmatprep.subr.bf16.mxu0 %v431_v33  ;;  %450 = vmatpush1.bf16.msra.mxu1 %v449_v10  ;;  %v225_v33 = vld [vmem:[#allocation7 + $0x80] sm:$0xff] }
  0x4e   :  { %452 = vmatprep.subr.bf16.mxu1 %v451_v11  ;;  %v461_v35 = vpack.c.bf16 %v227_v34, %v225_v33 }
  0x50   :  { %434 = vmatpush3.bf16.msra.mxu0 %v433_v38  ;;  %v463_v38 = vpack.c.bf16 %v232_v37, %v230_v36 }
  0x51   :  { %436 = vmatprep.subr.bf16.mxu0 %v435_v39  ;;  %454 = vmatpush1.bf16.msra.mxu1 %v453_v16  ;;  %v229_v39 = vld [vmem:[#allocation7 + $0xa0] sm:$0xff] }
  0x52   :  { %456 = vmatprep.subr.bf16.mxu1 %v455_v17  ;;  %v465_v41 = vpack.c.bf16 %v231_v40, %v229_v39 }
  0x54   :  { %438 = vmatpush3.bf16.msra.mxu0 %v437_v44  ;;  %v467_v44 = vpack.c.bf16 %v236_v43, %v234_v42 }
  0x55   :  { %440 = vmatprep.subr.bf16.mxu0 %v439_v45  ;;  %458 = vmatpush1.bf16.msra.mxu1 %v457_v29  ;;  %v233_v45 = vld [vmem:[#allocation7 + $0xc0] sm:$0xff] }
  0x56   :  { %460 = vmatprep.subr.bf16.mxu1 %v459_v32  ;;  %v469_v47 = vpack.c.bf16 %v235_v46, %v233_v45 }
  0x58   :  { %442 = vmatpush3.bf16.msra.mxu0 %v441_v48  ;;  %v238_v48 = vld [vmem:[#allocation7 + $0xe8] sm:$0xff] }
  0x59   :  { %462 = vmatpush1.bf16.msra.mxu1 %v461_v35 }
  0x5a   :  { %464 = vmatprep.subr.bf16.mxu1 %v463_v38 }
  0x5b   :  { %173 = vmatmul.mubr.f32.vlgmr.msra.gmra.mrb[0].mxu0 %v704_v49 }
  0x5c   :  { %177 = vmatprep.mubr.f32.mxu0 %v706_v50 }
  0x5d   :  { %466 = vmatpush1.bf16.msra.mxu1 %v465_v41 }
  0x5e   :  { %468 = vmatprep.subr.bf16.mxu1 %v467_v44 }
  0x5f   :  { %178 = vmatmul.mubr.f32.gmra.mrb[2].mxu0 %v710_v51 }
  0x61   :  { %470 = vmatpush1.bf16.msra.mxu1 %v469_v47 }
 0x12e   :  { %v405_v52 = vpop.f32.mrb[0].mxu0 }
 0x12f   :  { %v406_v54 = vpop.f32.mrb[1].mxu0 }
 0x130   :  { %v407_v55 = vadd.f32 %v406_v54, %v405_v52  ;;  %v240_v52 = vld [vmem:[#allocation7 + $0xf8] sm:$0xff]  ;;  %v237_v54 = vld [vmem:[#allocation7 + $0xe0] sm:$0xff] }
 0x132   :  { %v175_v56 = vadd.f32 %v407_v55, %v372_v53  ;;  %v408_v57 = vpop.f32.mrb[2].mxu0  ;;  %v239_v55 = vld [vmem:[#allocation7 + $0xf0] sm:$0xff] }
 0x133   :  { %v409_v58 = vpop.f32.mrb[3].mxu0 }
 0x134   :  { %183 = vst [vmem:[#allocation9] sm:$0xff] %v175_v56  ;;  %v410_v59 = vadd.f32 %v409_v58, %v408_v57  ;;  %185 = vmax.xlane.f32.xlu0 %v175_v56  ;;  %v618_v57 = vmov 0.0  }
 0x135   :  { %317 = vmatprep.mubr.f32.mxu1 %v618_v57 }
 0x136   :  { %v180_v60 = vadd.f32 %v410_v59, %v372_v53  ;;  %v471_v53 = vpack.c.bf16 %v240_v52, %v238_v48 }
 0x138   :  { %184 = vst [vmem:[#allocation9 + $0x8] sm:$0xff] %v180_v60  ;;  %187 = vmax.xlane.f32.xlu0 %v180_v60  ;;  %472 = vmatprep.subr.bf16.mxu1 %v471_v53 }
 0x1c1   :  { %v186_v18 = vpop.xlane.xlu0 %185 }
 0x1c2   :  { %v189_v19 = vsub.f32 %v175_v56, %v186_v18  ;;  %v473_v56 = vpack.c.bf16 %v239_v55, %v237_v54 }
 0x1c4   :  { %v191_v20 = vmul.f32 1.442695, %v189_v19  ;;  %474 = vmatpush1.bf16.msra.mxu1 %v473_v56 }
 0x1c5   :  { %v188_v21 = vpop.xlane.xlu0 %187 }
 0x1c6   :  { %485 = vpow2.f32 %v191_v20  ;;  %v190_v22 = vsub.f32 %v180_v60, %v188_v21 }
 0x1c8   :  { %v193_v23 = vmul.f32 1.442695, %v190_v22 }
 0x1ca   :  { %487 = vpow2.f32 %v193_v23 }
 0x1d0   :  { %v486_v24 = vpop.eup %485 }
 0x1d1   :  { %195 = vadd.xlane.f32.xlu1 %v486_v24 }
 0x1d4   :  { %v488_v26 = vpop.eup %487 }
 0x1d5   :  { %197 = vadd.xlane.f32.xlu1 %v488_v26 }
 0x25e   :  { %v196_v58 = vpop.xlane.xlu1 %195 }
 0x25f   :  { %489 = vrcp.f32 %v196_v58 }
 0x262   :  { %v198_v59 = vpop.xlane.xlu1 %197 }
 0x263   :  { %491 = vrcp.f32 %v198_v59 }
 0x269   :  { %v490_v60 = vpop.eup %489 }
 0x26a   :  { %v201_v61 = vmul.f32 %v490_v60, %v196_v58 }
 0x26c   :  { %v203_v62 = vsub.f32 2.0, %v201_v61 }
 0x26d   :  { %v492_v63 = vpop.eup %491 }
 0x26e   :  { %v205_v0 = vmul.f32 %v490_v60, %v203_v62  ;;  %v202_v1 = vmul.f32 %v492_v63, %v198_v59 }
 0x270   :  { %v204_v2 = vsub.f32 2.0, %v202_v1  ;;  %v207_v3 = vmul.f32 %v486_v24, %v205_v0 }
 0x272   :  { %v206_v4 = vmul.f32 %v492_v63, %v204_v2  ;;  %318 = vmatmul.mubr.f32.vlgmr.msra.gmra.mrb[0].mxu1 %v207_v3 }
 0x273   :  { %323 = vmatprep.mubr.f32.mxu1 %v618_v57 }
 0x274   :  { %v208_v5 = vmul.f32 %v488_v26, %v206_v4 }
 0x276   :  { %324 = vmatmul.mubr.f32.gmra.mrb[2].mxu1 %v208_v5 }
 0x277   :  { %570 = shalt.err (!%p567_p0)
}
 0x278   :  { %s571_s18 = scalar_lea.hbm %s759_s6, 256 }
 0x279   :  { %p572_p1 = scmp.ne.s32.totalorder %s759_s6, %s571_s18  ;;  %p575_p2 = scmp.lt.u32.totalorder %s571_s18, %s759_s6 }
 0x27b   :  { %p577_p3 = pnand %p575_p2, %p572_p1 }
 0x27d   :  { %580 = shalt.err (!%p577_p3)
}
 0x27e   :  { %361 = dma.vmem_to_hbm [thread:$0]  %s356_s14, 256, %s759_s6, [#allocation10], %s612_s7, %s612_s7, %s613_s8   ;;  %v243_v6 = vlaneseq }
 0x27f   :  { %v241_v9 = vld [vmem:[%s757_s4] sm:$0x3]  ;;  %s620_s6 = smov [#allocation8]  }
 0x280   :  { %v244_v7 = vshrl.u32 %v243_v6, 7  ;;  %s343_s7 = sshll.u32 %s620_s6, 4  ;;  %s344_s7 = int_to_ptr.vmem [resolvable:$true] %s343_s7 }
 0x281   :  { %s581_s4 = scalar_lea.vmem %s344_s7, 512  ;;  %p586_p5 = scmp.lt.s32.totalorder %s344_s7, %s344_s7 }
 0x282   :  { %v245_v8 = vsub.s32 0, %v244_v7  ;;  %v249_v10 = vsub.s32 1, %v244_v7  ;;  %p582_p4 = scmp.ne.s32.totalorder %s344_s7, %s581_s4  ;;  %p587_p6 = scmp.lt.s32.totalorder %s581_s4, %s581_s4 }
 0x284   :  { %v246_v11 = vrot.slane %v241_v9, %v245_v8  ;;  %v250_v12 = vrot.slane %v241_v9, %v249_v10  ;;  %p588_p7 = por %p587_p6, %p586_p5 }
 0x286   :  { %p589_p8 = pnand %p588_p7, %p582_p4 }
 0x345   :  { %v319_v13 = vpop.f32.mrb[0].mxu1 }
 0x346   :  { %v320_v14 = vadd.f32 %v319_v13, %v246_v11  ;;  %v321_v15 = vpop.f32.mrb[1].mxu1 }
 0x347   :  { %v322_v16 = vadd.f32 %v321_v15, %v250_v12 }
 0x348   :  { %v330_v17 = vadd.f32 %v320_v14, %v704_v49 }
 0x349   :  { %v331_v18 = vadd.f32 %v322_v16, %v701_v25  ;;  %v325_v19 = vpop.f32.mrb[2].mxu1 }
 0x34a   :  { %334 = vst [vmem:[#allocation8] sm:$0xff] %v330_v17  ;;  %v326_v20 = vadd.f32 %v325_v19, %v246_v11  ;;  %v327_v21 = vpop.f32.mrb[3].mxu1 }
 0x34b   :  { %335 = vst [vmem:[#allocation8 + $0x8] sm:$0xff] %v331_v18  ;;  %v328_v22 = vadd.f32 %v327_v21, %v250_v12 }
 0x34c   :  { %v332_v23 = vadd.f32 %v326_v20, %v710_v51 }
 0x34d   :  { %v333_v24 = vadd.f32 %v328_v22, %v706_v50 }
 0x34e   :  { %336 = vst [vmem:[#allocation8 + $0x10] sm:$0xff] %v332_v23 }
 0x34f   :  { %337 = vst [vmem:[#allocation8 + $0x18] sm:$0xff] %v333_v24 }
 0x350   :  { %592 = shalt.err (!%p589_p8)
}
 0x351   :  { %s593_s29 = scalar_lea.hbm %s758_s5, 512 }
 0x352   :  { %p594_p9 = scmp.ne.s32.totalorder %s758_s5, %s593_s29  ;;  %p597_p10 = scmp.lt.u32.totalorder %s593_s29, %s758_s5 }
 0x354   :  { %p599_p11 = pnand %p597_p10, %p594_p9 }
 0x356   :  { %602 = shalt.err (!%p599_p11)
}
 0x357   :  { %349 = dma.vmem_to_hbm [thread:$0]  %s344_s7, 512, %s758_s5, [#allocation4], %s615_s1, %s615_s1, %s616_s21  }
 0x358   :  { %607 = dma.done.wait [#allocation4], 512  }
 0x359   :  { %608 = vsyncadd [#allocation4], 4294966784 }
 0x35a   :  { %609 = dma.done.wait [#allocation10], 256  }
 0x35b   :  { %610 = vsyncadd [#allocation10], 4294967040 }
 0x35c   :  { %368 = vsyncpa [#allocation3], 1 }
 0x35d   :  { %369 = vsyncpa [#allocation6], 1 }
 0x35e   :  { %370 = vsyncpa [#allocation4], 1 }
 0x35f   :  { %371 = vsyncpa [#allocation10], 1 }

</bundles_post_ra>
